<compile_context>
chip_gen: v6e
topology: v6e:2x2x1
jax: 0.10.0
libtpu: 0.0.40
codegen_flags: <defaults>
</compile_context>

<pallas_src>
import functools
import math

import jax
import jax.numpy as jnp
from jax import lax
from jax.experimental import pallas as pl
from jax.experimental.pallas import tpu as pltpu

LANES = 128            # TPU vreg lane width
TQ_MAX = 4096          # max tokens per grid step (amortizes ~0.35us/step overhead)
_VMEM_FRACTION = 0.8   # fraction of physical per-core VMEM we let Mosaic use


def _round_up(a, b):
    return ((a + b - 1) // b) * b


def _cdiv(a, b):
    return -(-a // b)


@functools.lru_cache(maxsize=None)
def _vmem_capacity_bytes():
    """Physical per-TensorCore VMEM (generation aware; conservative fallback)."""
    try:
        cap = int(getattr(pltpu.get_tpu_info(), "vmem_capacity_bytes", 0))
        if cap > 0:
            return cap
    except Exception:
        pass
    return 64 << 20   # v7x per-core size; a safe lower bound on v5e/v6e too


@functools.lru_cache(maxsize=None)
def _tensorcores_per_chip():
    """Best-effort megacore detection (v7x has 2 TensorCores per chip)."""
    try:
        kind = str(getattr(jax.devices()[0], "device_kind", "")).lower()
        if "v7" in kind or "tpu7" in kind:
            return 2
    except Exception:
        pass
    return 1


@functools.lru_cache(maxsize=None)
def _single_buffer_supported():
    """One-time eager probe: can a constant-index BlockSpec use pl.Buffered(1)?

    Replaces the old per-call try/except + block_until_ready.  Always executed
    outside any trace (called from the non-jitted planning wrapper).
    """
    def _probe_kernel(a_ref, b_ref, o_ref):
        o_ref[...] = a_ref[...] + b_ref[...]

    try:
        a = jnp.zeros((16, LANES), jnp.float32)
        b = jnp.zeros((8, LANES), jnp.float32)
        out = pl.pallas_call(
            _probe_kernel,
            out_shape=jax.ShapeDtypeStruct((16, LANES), jnp.float32),
            grid_spec=pltpu.PrefetchScalarGridSpec(
                num_scalar_prefetch=0,
                grid=(2,),
                in_specs=[
                    pl.BlockSpec((8, LANES), lambda i: (i, 0)),
                    pl.BlockSpec((8, LANES), lambda i: (0, 0),
                                 pipeline_mode=pl.Buffered(1)),
                ],
                out_specs=pl.BlockSpec((8, LANES), lambda i: (i, 0)),
            ),
            compiler_params=pltpu.CompilerParams(
                dimension_semantics=("parallel",)),
        )(a, b)
        jax.block_until_ready(out)
        return True
    except Exception:
        return False


def _group_for(E):
    return LANES // E if (E < LANES and LANES % E == 0) else 1


def _onehot_path_ok(V, E, table_dtype):
    """Is the VMEM-resident one-hot-matmul gather the right strategy?"""
    group = _group_for(E)
    cap = _vmem_capacity_bytes()
    budget = int(_VMEM_FRACTION * cap)
    w_bytes = (group * V) * (group * E) * jnp.dtype(table_dtype).itemsize
    # One-hot costs O(V) compares + O(V*E) MACs per token, so large vocabularies
    # lose to a row gather even while the table still fits VMEM.  Earlier
    # cutoff on 64 MiB-VMEM parts (v7x).
    max_vocab = 2048 if cap <= (64 << 20) else 4096
    if V > max_vocab:
        return False
    # The packed table (worst case double-buffered) must leave room for tiles.
    if 2 * w_bytes > budget // 2:
        return False
    return True


def _plan(N, V, E, table_dtype):
    """Static tiling plan -> (group, tq, single_buffer_table, vmem_limit_bytes)."""
    group = _group_for(E)
    tile_unit = 8 * group                          # keeps block sublanes % 8 == 0
    itemsize = jnp.dtype(table_dtype).itemsize
    acc_itemsize = 2 if jnp.dtype(table_dtype) == jnp.bfloat16 else 4

    single_buffer = _single_buffer_supported()
    table_bufs = 1 if single_buffer else 2
    w_bytes = (group * V) * (group * E) * itemsize

    budget = int(_VMEM_FRACTION * _vmem_capacity_bytes())
    fixed = table_bufs * w_bytes + (2 << 20)            # table + internal scratch
    per_token = (V * acc_itemsize                        # packed one-hot
                 + V                                     # bool compare temps
                 + 2 * E * itemsize                      # double-buffered out block
                 + 4 * E                                 # f32 matmul result
                 + 2 * (LANES * 4) // group)             # lane-padded ids block x2
    tq_cap = max(tile_unit, (budget - fixed) // (2 * per_token))
    tq_cap = min(TQ_MAX, tq_cap)
    tq_cap = max(tile_unit, (tq_cap // tile_unit) * tile_unit)

    # Balance tiles to minimise tail padding; keep >= 2 grid steps on 2-core
    # chips (v7x) so the "parallel" token axis can shard across TensorCores.
    num_tiles = max(1, _cdiv(N, tq_cap))
    if _tensorcores_per_chip() >= 2 and N > tile_unit:
        num_tiles = max(num_tiles, 2)
    tq = min(tq_cap, _round_up(_cdiv(N, num_tiles), tile_unit))
    tq = max(tile_unit, tq)

    vmem_limit = min(budget, fixed + 2 * per_token * tq + (16 << 20))
    vmem_limit = max(vmem_limit, 16 << 20)
    return group, int(tq), single_buffer, int(vmem_limit)


def _embedding_gather_kernel(ids_ref, table_ref, out_ref, *, acc_dtype):
    # ids_ref  : (rows, group) int32   slot-offset token ids (id + slot*V)
    # table_ref: (group*V, group*E)    block-diagonal packed embedding table
    # out_ref  : (rows, group*E)       lane-dense packed embeddings
    rows, group = ids_ref.shape
    kv = table_ref.shape[0]
    ids = ids_ref[...]
    lane = lax.broadcasted_iota(jnp.int32, (rows, kv), 1)
    hit = lane == ids[:, 0:1]
    for s in range(1, group):                 # static unroll, group = 128 // E
        hit = jnp.logical_or(hit, lane == ids[:, s:s + 1])
    onehot = hit.astype(acc_dtype)            # bf16 one-hot iff the table is bf16
    # Exactly one 1.0 * value term per output element, accumulated in f32.
    gathered = jnp.dot(onehot, table_ref[...], preferred_element_type=jnp.float32)
    out_ref[...] = gathered.astype(out_ref.dtype)


@functools.partial(jax.jit,
                   static_argnames=("group", "tq", "single_buffer", "vmem_limit"))
def _embedding_pallas_jit(x, table, *, group, tq, single_buffer, vmem_limit):
    V, E = table.shape
    acc_dtype = jnp.bfloat16 if table.dtype == jnp.bfloat16 else jnp.float32

    orig_shape = x.shape
    N = math.prod(orig_shape)
    n_pad = _round_up(N, tq)
    rows = n_pad // group
    r_blk = tq // group

    ids = jnp.pad(x.reshape(N).astype(jnp.int32), (0, n_pad - N))
    if group > 1:
        # Slot-offset ids so the packed one-hot addresses the block-diag table.
        ids = ids.reshape(rows, group) + (jnp.arange(group, dtype=jnp.int32) * V)[None, :]
        w = jnp.zeros((group * V, group * E), table.dtype)
        for s in range(group):
            w = lax.dynamic_update_slice(w, table, (s * V, s * E))
    else:
        ids = ids.reshape(rows, 1)
        w = table
    kv, ne = w.shape

    if single_buffer:
        # Constant index_map across the grid -> one resident buffer is enough
        # (halves the table footprint; matters on v7x's 64 MiB VMEM).
        table_spec = pl.BlockSpec((kv, ne), lambda i: (0, 0),
                                  pipeline_mode=pl.Buffered(1))
    else:
        table_spec = pl.BlockSpec((kv, ne), lambda i: (0, 0))

    packed = pl.pallas_call(
        functools.partial(_embedding_gather_kernel, acc_dtype=acc_dtype),
        out_shape=jax.ShapeDtypeStruct((rows, ne), table.dtype),
        grid_spec=pltpu.PrefetchScalarGridSpec(
            num_scalar_prefetch=0,
            grid=(n_pad // tq,),
            in_specs=[
                pl.BlockSpec((r_blk, ids.shape[1]), lambda i: (i, 0)),  # ids tile
                table_spec,                                             # table
            ],
            out_specs=pl.BlockSpec((r_blk, ne), lambda i: (i, 0)),
        ),
        compiler_params=pltpu.CompilerParams(
            dimension_semantics=("parallel",),
            vmem_limit_bytes=vmem_limit,
        ),
    )(ids, w)

    out = packed.reshape(n_pad, E)[:N]
    return out.reshape(orig_shape + (E,))


@jax.jit
def _embedding_take_jit(x, table):
    return jnp.take(table, x.astype(jnp.int32), axis=0)


def class_embedding(x, table, *, min_pallas_tokens=256):
    """Pallas equivalent of ClassEmbedding.forward: table[x], shape x.shape + (E,)."""
    V, E = table.shape
    N = math.prod(x.shape)
    if N < min_pallas_tokens or not _onehot_path_ok(V, E, table.dtype):
        # Tiny inputs: the fixed Pallas launch/DMA overhead dwarfs the work.
        # Huge vocabularies: the O(V)-per-token one-hot loses to a row gather.
        # TODO(synk): replace this XLA fallback with a scalar-prefetch HBM
        # row-DMA gather kernel (table kept in HBM via memory_space=pl.ANY).
        return _embedding_take_jit(x, table)
    group, tq, single_buffer, vmem_limit = _plan(N, V, E, table.dtype)
    return _embedding_pallas_jit(x, table, group=group, tq=tq,
                                 single_buffer=single_buffer,
                                 vmem_limit=vmem_limit)


if __name__ == "__main__":
    key = jax.random.PRNGKey(0)
    k_tab, k_idx, k_idx2, k_tab3, k_idx3 = jax.random.split(key, 5)

    # Shapes implied by the module: an (n_token, word_emb_size) GloVe table and
    # a batch of token-id sequences.
    V, E = 64, 32          # n_token, word_emb_size (deterministic synthetic "GloVe")
    B, S = 2, 8            # batch, sequence length

    table = jax.random.normal(k_tab, (V, E), dtype=jnp.float32)
    x = jax.random.randint(k_idx, (B, S), 0, V, dtype=jnp.int32)

    # 1) Small spec-consistent shape, forced through the Pallas gather kernel.
    emb = jax.block_until_ready(class_embedding(x, table, min_pallas_tokens=1))
    assert emb.shape == (B, S, E) and emb.dtype == table.dtype
    assert jnp.allclose(emb, table[x], rtol=1e-2, atol=1e-5)

    # 2) Larger batch via the default path: multi-step grid + tail padding.
    B2, S2 = 4, 1201
    x2 = jax.random.randint(k_idx2, (B2, S2), 0, V, dtype=jnp.int32)
    emb2 = jax.block_until_ready(class_embedding(x2, table))
    assert emb2.shape == (B2, S2, E)
    assert jnp.allclose(emb2, table[x2], rtol=1e-2, atol=1e-5)

    # 3) Wide-embedding path (E >= 128 -> no lane packing, group == 1).
    V3, E3 = 32, 128
    table3 = jax.random.normal(k_tab3, (V3, E3), dtype=jnp.float32)
    x3 = jax.random.randint(k_idx3, (B, S), 0, V3, dtype=jnp.int32)
    emb3 = jax.block_until_ready(class_embedding(x3, table3, min_pallas_tokens=1))
    assert jnp.allclose(emb3, table3[x3], rtol=1e-2, atol=1e-5)

    print("KERNEL_OK")
</pallas_src>

<mosaic_0001>
module attributes {stable_mosaic.version = 11 : i64} {
  func.func @_probe_kernel(%arg0: i32, %arg1: memref<8x128xf32, #tpu.memory_space<vmem>>, %arg2: memref<8x128xf32, #tpu.memory_space<vmem>>, %arg3: memref<8x128xf32, #tpu.memory_space<vmem>>) attributes {dimension_semantics = [#tpu.dimension_semantics<parallel>], iteration_bounds = array<i64: 2>, scalar_prefetch = 0 : i64, scratch_operands = 0 : i64, tpu.core_type = #tpu.core_type<tc>, window_params = [{transform_indices = @transform_0, window_bounds = array<i64: 8, 128>}, {pipeline_mode = #tpu.pipeline_mode<synchronous>, transform_indices = @transform_1, window_bounds = array<i64: 8, 128>}, {transform_indices = @transform_2, window_bounds = array<i64: 8, 128>}]} {
    %c0 = arith.constant 0 : index
    %c0_0 = arith.constant 0 : index
    %0 = vector.load %arg1[%c0, %c0_0] : memref<8x128xf32, #tpu.memory_space<vmem>>, vector<8x128xf32>
    %c0_1 = arith.constant 0 : index
    %c0_2 = arith.constant 0 : index
    %1 = vector.load %arg2[%c0_1, %c0_2] : memref<8x128xf32, #tpu.memory_space<vmem>>, vector<8x128xf32>
    %2 = arith.addf %0, %1 : vector<8x128xf32>
    %c0_3 = arith.constant 0 : index
    %c0_4 = arith.constant 0 : index
    %3 = vector.load %arg3[%c0_3, %c0_4] : memref<8x128xf32, #tpu.memory_space<vmem>>, vector<8x128xf32>
    tpu.vector_store %arg3[%c0_3, %c0_4], %2 {strides = array<i32>} : memref<8x128xf32, #tpu.memory_space<vmem>>, vector<8x128xf32>,
    return
  }
  func.func @transform_0(%arg0: i32) -> (i32, i32) {
    %c0_i32 = arith.constant 0 : i32
    %c0_i32_0 = arith.constant 0 : i32
    return %arg0, %c0_i32 : i32, i32
  }
  func.func @transform_1(%arg0: i32) -> (i32, i32) {
    %c0_i32 = arith.constant 0 : i32
    %c0_i32_0 = arith.constant 0 : i32
    %c0_i32_1 = arith.constant 0 : i32
    return %c0_i32, %c0_i32_0 : i32, i32
  }
  func.func @transform_2(%arg0: i32) -> (i32, i32) {
    %c0_i32 = arith.constant 0 : i32
    %c0_i32_0 = arith.constant 0 : i32
    return %arg0, %c0_i32 : i32, i32
  }
}

module attributes {stable_mosaic.version = 11 : i64} {
  func.func @_embedding_gather_kernel(%arg0: i32, %arg1: memref<8x4xi32, #tpu.memory_space<vmem>>, %arg2: memref<256x128xf32, #tpu.memory_space<vmem>>, %arg3: memref<8x128xf32, #tpu.memory_space<vmem>>) attributes {dimension_semantics = [#tpu.dimension_semantics<parallel>], iteration_bounds = array<i64: 1>, scalar_prefetch = 0 : i64, scratch_operands = 0 : i64, tpu.core_type = #tpu.core_type<tc>, window_params = [{transform_indices = @transform_0, window_bounds = array<i64: 8, 4>}, {pipeline_mode = #tpu.pipeline_mode<synchronous>, transform_indices = @transform_1, window_bounds = array<i64: 256, 128>}, {transform_indices = @transform_2, window_bounds = array<i64: 8, 128>}]} {
    %c0 = arith.constant 0 : index
    %c0_0 = arith.constant 0 : index
    %0 = vector.load %arg1[%c0, %c0_0] : memref<8x4xi32, #tpu.memory_space<vmem>>, vector<8x4xi32>
    %1 = tpu.iota {dimensions = array<i32: 1>} : vector<8x256xi32>
    %2 = vector.extract_strided_slice %0 {offsets = [0, 0], sizes = [8, 1], strides = [1, 1]} : vector<8x4xi32> to vector<8x1xi32>
    %3 = vector.broadcast %2 : vector<8x1xi32> to vector<8x256xi32>
    %4 = arith.cmpi eq, %1, %3 : vector<8x256xi32>
    %5 = vector.extract_strided_slice %0 {offsets = [0, 1], sizes = [8, 1], strides = [1, 1]} : vector<8x4xi32> to vector<8x1xi32>
    %6 = vector.broadcast %5 : vector<8x1xi32> to vector<8x256xi32>
    %7 = arith.cmpi eq, %1, %6 : vector<8x256xi32>
    %8 = arith.ori %4, %7 : vector<8x256xi1>
    %9 = vector.extract_strided_slice %0 {offsets = [0, 2], sizes = [8, 1], strides = [1, 1]} : vector<8x4xi32> to vector<8x1xi32>
    %10 = vector.broadcast %9 : vector<8x1xi32> to vector<8x256xi32>
    %11 = arith.cmpi eq, %1, %10 : vector<8x256xi32>
    %12 = arith.ori %8, %11 : vector<8x256xi1>
    %13 = vector.extract_strided_slice %0 {offsets = [0, 3], sizes = [8, 1], strides = [1, 1]} : vector<8x4xi32> to vector<8x1xi32>
    %14 = vector.broadcast %13 : vector<8x1xi32> to vector<8x256xi32>
    %15 = arith.cmpi eq, %1, %14 : vector<8x256xi32>
    %16 = arith.ori %12, %15 : vector<8x256xi1>
    %17 = arith.extui %16 : vector<8x256xi1> to vector<8x256xi32>
    %18 = arith.sitofp %17 : vector<8x256xi32> to vector<8x256xf32>
    %c0_1 = arith.constant 0 : index
    %c0_2 = arith.constant 0 : index
    %19 = vector.load %arg2[%c0_1, %c0_2] : memref<256x128xf32, #tpu.memory_space<vmem>>, vector<256x128xf32>
    %cst = arith.constant dense<0.000000e+00> : vector<8x128xf32>
    %20 = tpu.matmul %18, %19, %cst {dimension_numbers = #tpu.dot_dimension_numbers<[1], [0], [0], [1], [0, 0, 1, 1], [], []>} : vector<8x256xf32>, vector<256x128xf32>, vector<8x128xf32> -> vector<8x128xf32>
    %c0_3 = arith.constant 0 : index
    %c0_4 = arith.constant 0 : index
    %21 = vector.load %arg3[%c0_3, %c0_4] : memref<8x128xf32, #tpu.memory_space<vmem>>, vector<8x128xf32>
    tpu.vector_store %arg3[%c0_3, %c0_4], %20 {strides = array<i32>} : memref<8x128xf32, #tpu.memory_space<vmem>>, vector<8x128xf32>,
    return
  }
  func.func @transform_0(%arg0: i32) -> (i32, i32) {
    %c0_i32 = arith.constant 0 : i32
    %c0_i32_0 = arith.constant 0 : i32
    return %arg0, %c0_i32 : i32, i32
  }
  func.func @transform_1(%arg0: i32) -> (i32, i32) {
    %c0_i32 = arith.constant 0 : i32
    %c0_i32_0 = arith.constant 0 : i32
    %c0_i32_1 = arith.constant 0 : i32
    return %c0_i32, %c0_i32_0 : i32, i32
  }
  func.func @transform_2(%arg0: i32) -> (i32, i32) {
    %c0_i32 = arith.constant 0 : i32
    %c0_i32_0 = arith.constant 0 : i32
    return %arg0, %c0_i32 : i32, i32
  }
}

</mosaic_0001>

<bundles_post_ra>
// kernel: tpu_custom_call.1
= control target key start
LH: loop header
LB: loop body
LE: loop exit
PB: predicated region body
PF: predicated region fallthrough
CT: control target
= control target key end

     0   :  { %7 = vsyncpa [#allocation3], 0  ;;  %s649_s0 = inlined_call_operand.hbm [shape: f32[16,128], index: 0, kind: input, shape index: {}]   ;;  %s650_s1 = inlined_call_operand.hbm [shape: f32[8,128], index: 1, kind: input, shape index: {}]   ;;  %s651_s2 = inlined_call_operand.hbm [shape: f32[16,128], index: 2, kind: output, shape index: {}]  }
   0x1   :  { %9 = vsyncpa [#allocation3 + $0x1], 0 }
   0x2   :  { %10 = vsyncpa [#allocation6], 0 }
   0x3   :  { %11 = vsyncpa [#allocation4], 0 }
   0x4   :  { %13 = vsyncpa [#allocation4 + $0x1], 0  ;;  %s483_s9 = smov 0   ;;  %s485_s10 = smov 0  }
   0x5   :  { %s487_s11 = smov 0   ;;  %s489_s12 = smov 0  }
   0x6 LB: > { %s504_s13 = sadd.s32 4294967295, %s463_s12   ;;  %s270_s14 = sadd.s32 4294967294, %s463_s12   ;;  %s463_s12 = sphi %s489_s12, %s674_s12   ;;  %s459_s11 = sphi %s487_s11, %s673_s11   ;;  %s455_s10 = sphi %s485_s10, %s672_s10   ;;  %s451_s9 = sphi %s483_s9, %s671_s9  }
   0x7   : > { %p39_p0 = scmp.ne.s32.totalorder %s455_s10, %s451_s9  ;;  %p652_p1 = scmp.eq.s32.totalorder %s504_s13, 0 }
   0x8   : > { %p90_p3 = scmp.eq.s32.totalorder %s270_s14, 1  ;;  %p271_p5 = scmp.ge.s32.totalorder %s463_s12, 1 }
   0x9   : > { %p513_p4 = por %p652_p1, %p39_p0  ;;  %p97_p7 = scmp.lt.s32.totalorder %s463_s12, 3 }
   0xa   : > { %p518_p6 = por %p90_p3, %p39_p0  ;;  %s465_s18 = smov [#allocation5]  }
   0xb   : > { %s656_s15 = scalar_select %p513_p4, 1, 0 }
   0xc   : > { %s657_s16 = scalar_select %p518_p6, 1, 0 }
   0xd   : > { %p523_p8 = pnand %p271_p5, %p97_p7  ;;  %s110_s19 = sshll.u32 %s465_s18, 4  ;;  %s111_s19 = int_to_ptr.vmem [resolvable:$true] %s110_s19 }
   0xe   : > { %s531_s20 = sadd.s32 1, %s463_s12   ;;  %s26_s24 = sadd.s32 1, %s459_s11 }
   0xf   : > { %s658_s17 = scalar_select %p523_p8, 1, 0 }
  0x10   : > { %p292_p10 = pneg %p523_p8  ;;  %s23_s22 = ssub.s32 %s463_s12, %s531_s20 }
  0x11   : > { %p541_p12 = scmp.eq.s32.totalorder %s23_s22, 0  ;;  %p33_p13 = scmp.ne.s32.totalorder %s459_s11, %s455_s10 }
  0x12   : > { %p535_p11 = pnand %p292_p10, %p652_p1  ;;  %s352_s25 = scalar_lea.vmem %s111_s19, 128 }
  0x13   : > { %p353_p3 = scmp.ne.s32.totalorder %s111_s19, %s352_s25  ;;  %p360_p9 = scmp.lt.s32.totalorder %s111_s19, %s111_s19 }
  0x14   : > { %p343_p0 = pneg %p535_p11  ;;  %p361_p2 = scmp.lt.s32.totalorder %s352_s25, %s352_s25 }
  0x16   : > { %p355_p5 = pnand %p353_p3, %p343_p0  ;;  %p362_p10 = por %p361_p2, %p360_p9 }
  0x18   : > { %p356_p7 = pneg %p355_p5 }
  0x1a   : > { %p363_p1 = pnand %p362_p10, %p356_p7 }
  0x1c   : > { %366 = shalt.err (!%p363_p1)
}
  0x1d   : > { %295 = dma.hbm_to_vmem [thread:$0]  (!%p535_p11), %s650_s1, 128, %s111_s19, [#allocation6]  }
  0x1e   : > { %s558_s28 = scalar_select %p541_p12, %s459_s11, %s26_s24  }
  0x1f   : > { %p34_p1 = scmp.eq.s32.totalorder %s463_s12, 0  ;;  %p661_p2 = scmp.eq.s32.totalorder %s504_s13, 1 }
  0x20   : > { %p305_p0 = scmp.lt.s32.totalorder %s463_s12, 2  ;;  %s121_s30 = sand.u32 1, %s459_s11  }
  0x21   : > { %p566_p9 = por %p661_p2, %p33_p13  ;;  %p35_p3 = por %p34_p1, %p33_p13 }
  0x22   : > { %s274_s3 = sshll.u32 %s121_s30, 3  ;;  %s275_s4 = sshll.u32 %s463_s12, 7 }
  0x23   : > { %s662_s29 = scalar_select %p566_p9, 1, 0 }
  0x24   : > { %s579_s7 = scalar_lea.hbm %s649_s0, %s275_s4  ;;  %s125_s8 = scalar_lea.vmem [#allocation2], %s274_s3 }
  0x25   : > { %s132_s14 = sshll.u32 %s125_s8, 4  ;;  %p581_p11 = pnand %p305_p0, %p35_p3  ;;  %s133_s14 = int_to_ptr.vmem [resolvable:$true] %s132_s14 }
  0x26   : > { %s122_s19 = scalar_lea.sflag [#allocation3], %s121_s30  ;;  %s367_s21 = scalar_lea.hbm %s579_s7, 128 }
  0x27   : > { %p368_p12 = scmp.ne.s32.totalorder %s579_s7, %s367_s21  ;;  %p369_p13 = pneg %p581_p11 }
  0x28   : > { %s372_s24 = scalar_lea.hbm %s649_s0, 256  ;;  %p373_p10 = scmp.lt.s32.totalorder %s579_s7, %s649_s0 }
  0x29   : > { %p370_p5 = pnand %p369_p13, %p368_p12  ;;  %p374_p1 = scmp.lt.s32.totalorder %s372_s24, %s367_s21 }
  0x2b   : > { %p371_p7 = pneg %p370_p5  ;;  %p375_p2 = por %p374_p1, %p373_p10 }
  0x2d   : > { %p376_p0 = pnand %p375_p2, %p371_p7 }
  0x2f   : > { %379 = shalt.err (!%p376_p0)
}
  0x30   : > { %s380_s27 = scalar_lea.vmem %s133_s14, 128  ;;  %s466_s30 = smov [#allocation2]  }
  0x31   : > { %p381_p3 = scmp.ne.s32.totalorder %s133_s14, %s380_s27  ;;  %s385_s3 = sshll.u32 %s466_s30, 4  ;;  %s386_s3 = int_to_ptr.vmem [resolvable:$false] %s385_s3 }
  0x32   : > { %s387_s4 = scalar_lea.vmem %s386_s3, 256  ;;  %p388_p12 = scmp.lt.s32.totalorder %s133_s14, %s386_s3 }
  0x33   : > { %p383_p6 = pnand %p381_p3, %p369_p13  ;;  %p389_p5 = scmp.lt.s32.totalorder %s387_s4, %s380_s27 }
  0x35   : > { %p384_p9 = pneg %p383_p6  ;;  %p390_p4 = por %p389_p5, %p388_p12 }
  0x37   : > { %p391_p8 = pnand %p390_p4, %p384_p9 }
  0x39   : > { %394 = shalt.err (!%p391_p8)
}
  0x3a   : > { %299 = dma.hbm_to_vmem [thread:$0]  (!%p581_p11), %s579_s7, 128, %s133_s14, %s122_s19  }
  0x3b   : > { %p664_p7 = scmp.ne.s32.totalorder %s658_s17, 0 }
  0x3c   : > { %s602_s5 = sand.u32 (!%p664_p7), 1, %s455_s10   ;;  %p665_p6 = scmp.ne.s32.totalorder (!%p664_p7), %s656_s15, 0 }
  0x3d   : > { %141 = sbr.rel (%p664_p7) target bundleno = 95 (0x5f), region = 28  ;;  %s277_s6 = sshll.u32 (!%p664_p7), %s602_s5, 3 }
  0x3e   : > { %s144_s8 = scalar_lea.sflag (!%p664_p7), [#allocation3], %s602_s5  ;;  %s147_s21 = scalar_lea.vmem (!%p664_p7), [#allocation2], %s277_s6 }
  0x42   : > { %438 = dma.done.wait (%p665_p6), %s144_s8, 128  }
  0x43   : > { %440 = vsyncadd (%p665_p6), %s144_s8, 4294967168  ;;  %p666_p4 = scmp.eq.s32.totalorder %s504_s13, 0 }
  0x45   : > { %442 = dma.done.wait (%p666_p4), [#allocation6], 128   ;;  %p667_p8 = pmov %p666_p4 }
  0x46   : > { %s171_s17 = scalar_lea.vmem [#allocation7], %s277_s6  ;;  %s281_s14 = sshll.u32 %s504_s13, 7  ;;  %v172_v0 = vld [vmem:[%s147_s21] sm:$0xff]  ;;  %v173_v1 = vld [vmem:[#allocation5] sm:$0xff] }
  0x47   : > { %444 = vsyncadd (%p667_p8), [#allocation6], 4294967168  ;;  %s190_s7 = sshll.u32 %s171_s17, 4  ;;  %v174_v2 = vadd.f32 %v173_v1, %v172_v0  ;;  %s188_s15 = scalar_lea.hbm %s651_s2, %s281_s14  ;;  %s191_s7 = int_to_ptr.vmem [resolvable:$true] %s190_s7 }
  0x48   : > { %s177_s22 = scalar_lea.sflag [#allocation4], %s602_s5  ;;  %s395_s23 = scalar_lea.vmem %s191_s7, 128 }
  0x49   : > { %175 = vst [vmem:[%s171_s17] sm:$0xff] %v174_v2  ;;  %p396_p9 = scmp.ne.s32.totalorder %s191_s7, %s395_s23  ;;  %p668_p11 = scmp.ne.s32.totalorder %s662_s29, 0 }
  0x4a   : > { %s467_s24 = smov [#allocation7]  }
  0x4b   : > { %p397_p13 = pnand %p396_p9, %p668_p11  ;;  %s399_s25 = sshll.u32 %s467_s24, 4  ;;  %s400_s25 = int_to_ptr.vmem [resolvable:$false] %s399_s25 }
  0x4c   : > { %s401_s26 = scalar_lea.vmem %s400_s25, 256  ;;  %p402_p1 = scmp.lt.s32.totalorder %s191_s7, %s400_s25 }
  0x4d   : > { %p398_p10 = pneg %p397_p13  ;;  %p403_p2 = scmp.lt.s32.totalorder %s401_s26, %s395_s23 }
  0x4f   : > { %p404_p0 = por %p403_p2, %p402_p1 }
  0x51   : > { %p405_p3 = pnand %p404_p0, %p398_p10 }
  0x53   : > { %408 = shalt.err (!%p405_p3)
}
  0x54   : > { %s409_s13 = scalar_lea.hbm %s188_s15, 128  ;;  %s413_s3 = scalar_lea.hbm %s651_s2, 256 }
  0x55   : > { %p410_p12 = scmp.ne.s32.totalorder %s188_s15, %s409_s13  ;;  %p414_p6 = scmp.lt.s32.totalorder %s188_s15, %s651_s2 }
  0x56   : > { %p415_p4 = scmp.lt.s32.totalorder %s413_s3, %s409_s13 }
  0x57   : > { %p411_p5 = pnand %p410_p12, %p668_p11 }
  0x58   : > { %p416_p8 = por %p415_p4, %p414_p6 }
  0x59   : > { %p412_p7 = pneg %p411_p5 }
  0x5b   : > { %p417_p9 = pnand %p416_p8, %p412_p7 }
  0x5d   : > { %420 = shalt.err (!%p417_p9)
}
  0x5e   : > { %290 = dma.vmem_to_hbm [thread:$0]  (%p668_p11), %s191_s7, 128, %s188_s15, %s177_s22  }
  0x5f PF: > { %s202_s6 = sand.u32 1, %s451_s9   ;;  %p669_p13 = scmp.ne.s32.totalorder %s657_s16, 0 }
  0x60   : > { %p670_p10 = scmp.ge.s32.totalorder %s463_s12, 2  ;;  %s203_s8 = scalar_lea.sflag [#allocation4], %s202_s6 }
  0x62   : > { %p301_p1 = pnand %p670_p10, %p669_p13 }
  0x64   : > { %p302_p2 = pneg %p301_p1 }
  0x66   : > { %446 = dma.done.wait (%p302_p2), %s203_s8, 128  }
  0x67   : > { %448 = vsyncadd (%p302_p2), %s203_s8, 4294967168  ;;  %p16_p0 = scmp.ge.s32.totalorder %s531_s20, 4   ;;  %s671_s9 = smov %s455_s10 }
  0x68   : > { %s672_s10 = smov %s459_s11  ;;  %s673_s11 = smov %s558_s28 }
  0x69   : > { %s674_s12 = smov %s531_s20  ;;  %18 = sbr.rel (!%p16_p0) target bundleno = 6 (0x6), region = 77 }
  0x6e   :  { %208 = vsyncpa [#allocation3], 1 }
  0x6f   :  { %210 = vsyncpa [#allocation3 + $0x1], 1 }
  0x70   :  { %211 = vsyncpa [#allocation6], 1 }
  0x71   :  { %212 = vsyncpa [#allocation4], 1 }
  0x72   :  { %214 = vsyncpa [#allocation4 + $0x1], 1 }

// kernel: _embedding_pallas_jit.1
= control target key start
LH: loop header
LB: loop body
LE: loop exit
PB: predicated region body
PF: predicated region fallthrough
CT: control target
= control target key end

     0   :  { %v201_v0 = vmov 0   ;;  %v202_v2 = vmov 2   ;;  %v203_v7 = vmov 1   ;;  %v204_v8 = vmov 3   ;;  %s323_s0 = inlined_call_operand.vmem [shape: s32[8,4], index: 0, kind: input, shape index: {}]   ;;  %s324_s1 = inlined_call_operand.vmem [shape: f32[256,128], index: 1, kind: input, shape index: {}]   ;;  %s325_s2 = inlined_call_operand.vmem [shape: f32[8,128], index: 2, kind: output, shape index: {}]  }
   0x1   :  { %196 = vset.pattern.permute.xlu0 %v201_v0  ;;  %v11_v1 = vld [vmem:[%s323_s0] sm:$0xff]  ;;  %198 = vset.pattern.permute.xlu1 %v202_v2  ;;  %v76_v3 = vld [vmem:[%s324_s1 + $0xf8] sm:$0xff]  ;;  %v75_v5 = vld [vmem:[%s324_s1 + $0xf0] sm:$0xff]  ;;  %v12_v37 = vlaneseq  ;;  %v205_v44 = vmov 1.0  }
   0x2   :  { %v60_v4 = vld [vmem:[%s324_s1 + $0x78] sm:$0xff]  ;;  %16 = vperm.xlu0 %196, %v11_v1   ;;  %28 = vperm.xlu1 %198, %v11_v1   ;;  %v59_v6 = vld [vmem:[%s324_s1 + $0x70] sm:$0xff]  ;;  %v74_v9 = vld [vmem:[%s324_s1 + $0xe8] sm:$0xff] }
   0x3   :  { %156 = vmatprep.subr.mxu0 %v76_v3  ;;  %v58_v10 = vld [vmem:[%s324_s1 + $0x68] sm:$0xff]  ;;  %v73_v11 = vld [vmem:[%s324_s1 + $0xe0] sm:$0xff]  ;;  %v72_v13 = vld [vmem:[%s324_s1 + $0xd8] sm:$0xff]  ;;  %v13_v38 = vand.u32 127, %v12_v37 }
   0x4   :  { %157 = vmatpush3.msra.mxu0 %v60_v4  ;;  %v57_v12 = vld [vmem:[%s324_s1 + $0x60] sm:$0xff]  ;;  %v56_v14 = vld [vmem:[%s324_s1 + $0x58] sm:$0xff]  ;;  %v71_v15 = vld [vmem:[%s324_s1 + $0xd0] sm:$0xff] }
   0x5   :  { %158 = vmatprep.subr.mxu0 %v75_v5  ;;  %v55_v16 = vld [vmem:[%s324_s1 + $0x50] sm:$0xff]  ;;  %v70_v17 = vld [vmem:[%s324_s1 + $0xc8] sm:$0xff]  ;;  %v69_v19 = vld [vmem:[%s324_s1 + $0xc0] sm:$0xff]  ;;  %v14_v41 = vadd.s32 128, %v13_v38 }
   0x6   :  { %197 = vset.pattern.permute.xlu0 %v203_v7  ;;  %199 = vset.pattern.permute.xlu1 %v204_v8  ;;  %v54_v18 = vld [vmem:[%s324_s1 + $0x48] sm:$0xff]  ;;  %v53_v20 = vld [vmem:[%s324_s1 + $0x40] sm:$0xff]  ;;  %v68_v21 = vld [vmem:[%s324_s1 + $0xb8] sm:$0xff] }
   0x7   :  { %21 = vperm.xlu0 %197, %v11_v1   ;;  %35 = vperm.xlu1 %199, %v11_v1   ;;  %v52_v22 = vld [vmem:[%s324_s1 + $0x38] sm:$0xff]  ;;  %v67_v23 = vld [vmem:[%s324_s1 + $0xb0] sm:$0xff]  ;;  %v66_v25 = vld [vmem:[%s324_s1 + $0xa8] sm:$0xff] }
   0x8   :  { %159 = vmatpush3.msra.mxu0 %v59_v6  ;;  %v51_v24 = vld [vmem:[%s324_s1 + $0x30] sm:$0xff]  ;;  %v50_v26 = vld [vmem:[%s324_s1 + $0x28] sm:$0xff]  ;;  %v65_v27 = vld [vmem:[%s324_s1 + $0xa0] sm:$0xff] }
   0x9   :  { %160 = vmatprep.subr.mxu0 %v74_v9  ;;  %v49_v28 = vld [vmem:[%s324_s1 + $0x20] sm:$0xff]  ;;  %v64_v29 = vld [vmem:[%s324_s1 + $0x98] sm:$0xff]  ;;  %v63_v31 = vld [vmem:[%s324_s1 + $0x90] sm:$0xff] }
   0xa   :  { %161 = vmatpush3.msra.mxu0 %v58_v10  ;;  %v48_v30 = vld [vmem:[%s324_s1 + $0x18] sm:$0xff]  ;;  %v47_v32 = vld [vmem:[%s324_s1 + $0x10] sm:$0xff]  ;;  %v62_v33 = vld [vmem:[%s324_s1 + $0x88] sm:$0xff] }
   0xb   :  { %162 = vmatprep.subr.mxu0 %v73_v11  ;;  %200 = vset.pattern.permute.xlu0 %v204_v8  ;;  %v46_v34 = vld [vmem:[%s324_s1 + $0x8] sm:$0xff]  ;;  %v61_v35 = vld [vmem:[%s324_s1 + $0x80] sm:$0xff] }
   0xc   :  { %163 = vmatpush3.msra.mxu0 %v57_v12  ;;  %v45_v36 = vld [vmem:[%s324_s1] sm:$0xff] }
   0xd   :  { %164 = vmatprep.subr.mxu0 %v72_v13 }
   0xe   :  { %165 = vmatpush3.msra.mxu0 %v56_v14 }
   0xf   :  { %166 = vmatprep.subr.mxu0 %v71_v15 }
  0x10   :  { %167 = vmatpush3.msra.mxu0 %v55_v16 }
  0x11   :  { %168 = vmatprep.subr.mxu0 %v70_v17 }
  0x12   :  { %169 = vmatpush3.msra.mxu0 %v54_v18 }
  0x13   :  { %170 = vmatprep.subr.mxu0 %v69_v19 }
  0x14   :  { %171 = vmatpush3.msra.mxu0 %v53_v20 }
  0x15   :  { %172 = vmatprep.subr.mxu0 %v68_v21 }
  0x16   :  { %173 = vmatpush3.msra.mxu0 %v52_v22 }
  0x17   :  { %174 = vmatprep.subr.mxu0 %v67_v23 }
  0x18   :  { %175 = vmatpush3.msra.mxu0 %v51_v24 }
  0x19   :  { %176 = vmatprep.subr.mxu0 %v66_v25 }
  0x1a   :  { %177 = vmatpush3.msra.mxu0 %v50_v26 }
  0x1b   :  { %178 = vmatprep.subr.mxu0 %v65_v27 }
  0x1c   :  { %179 = vmatpush3.msra.mxu0 %v49_v28 }
  0x1d   :  { %180 = vmatprep.subr.mxu0 %v64_v29 }
  0x1e   :  { %181 = vmatpush3.msra.mxu0 %v48_v30 }
  0x1f   :  { %182 = vmatprep.subr.mxu0 %v63_v31 }
  0x20   :  { %183 = vmatpush3.msra.mxu0 %v47_v32 }
  0x21   :  { %184 = vmatprep.subr.mxu0 %v62_v33 }
  0x22   :  { %185 = vmatpush3.msra.mxu0 %v46_v34 }
  0x23   :  { %186 = vmatprep.subr.mxu0 %v61_v35 }
  0x24   :  { %187 = vmatpush3.msra.mxu0 %v45_v36 }
  0x7d   :  { %v17_v39 = vpop.permute.xlu0 %16  ;;  %v29_v40 = vpop.permute.xlu1 %28 }
  0x7e   :  { %vm18_vm0 = vcmp.eq.s32.totalorder %v13_v38, %v17_v39  ;;  %vm19_vm3 = vcmp.eq.s32.totalorder %v14_v41, %v17_v39  ;;  %vm30_vm6 = vcmp.eq.s32.totalorder %v13_v38, %v29_v40  ;;  %vm31_vm10 = vcmp.eq.s32.totalorder %v14_v41, %v29_v40 }
  0x82   :  { %v22_v42 = vpop.permute.xlu0 %21  ;;  %v36_v43 = vpop.permute.xlu1 %35 }
  0x83   :  { %vm23_vm1 = vcmp.eq.s32.totalorder %v13_v38, %v22_v42  ;;  %vm24_vm2 = vcmp.eq.s32.totalorder %v14_v41, %v22_v42  ;;  %vm37_vm5 = vcmp.eq.s32.totalorder %v13_v38, %v36_v43  ;;  %vm38_vm9 = vcmp.eq.s32.totalorder %v14_v41, %v36_v43 }
  0x84   :  { %vm25_vm4 = vmor %vm18_vm0, %vm23_vm1 }
  0x85   :  { %vm26_vm7 = vmor %vm19_vm3, %vm24_vm2 }
  0x86   :  { %vm32_vm8 = vmor %vm25_vm4, %vm30_vm6 }
  0x87   :  { %vm39_vm11 = vmor %vm32_vm8, %vm37_vm5 }
  0x88   :  { %vm33_vm12 = vmor %vm26_vm7, %vm31_vm10 }
  0x89   :  { %vm40_vm13 = vmor %vm33_vm12, %vm38_vm9 }
  0x8a   :  { %154 = vmatprep.mubr.msk.f32.mxu0 %vm40_vm13, %v205_v44 }
  0x8b   :  { %155 = vmatmul.mubr.msk.f32.vlgmr.msra.gmra.mxu0 %vm39_vm11, %v205_v44 }
 0x14b   :  { %v188_v45 = vpop.f32.mrf.mxu0 }
 0x14d   :  { %v189_v46 = vpop.f32.mrf.mxu0 }
 0x14e   :  { %v190_v47 = vadd.f32 %v189_v46, %v188_v45 }
 0x150   :  { %147 = vst [vmem:[%s325_s2] sm:$0xff] %v190_v47 }

</bundles_post_ra>
